<compile_context>
chip_gen: v7x
topology: tpu7x:2x2x1
jax: 0.10.0
libtpu: 0.0.40
codegen_flags: <defaults>
</compile_context>

<pallas_src>
import jax
import jax.numpy as jnp
from jax.experimental import pallas as pl
from jax.experimental.pallas import tpu as pltpu


_SLAB_BUDGET_BYTES = 4 * 1024 * 1024     # per pipelined buffer (x4: 2 in + 2 out)
_VMEM_LIMIT_BYTES = 48 * 1024 * 1024     # < v7x's 64 MiB physical; > v5e/v6e defaults
_MAX_TB = 8                              # cap on the static batch unroll in the kernel


def _diffusion_kernel(alpha_ref, x_ref, o_ref):
    """One grid step: a (TB, N, TD) tile.

    laplacian[i] = f[i+1] - 2 f[i] + f[i-1]   (interior)
    laplacian[0] = f[1]  - f[0]               (left boundary)
    laplacian[-1]= f[-2] - f[-1]              (right boundary)
    out = alpha * laplacian
    """
    alpha = alpha_ref[0]                   # f32 scalar, read once from SMEM
    tb, n, td = x_ref.shape                # static block shape

    if n == 1:
        # Degenerate case: Laplacian is all zeros.
        o_ref[...] = jnp.zeros_like(o_ref)
        return

    # Boundary-row masks, hoisted out of the batch loop (JAX doesn't CSE iota).
    row = jax.lax.broadcasted_iota(jnp.int32, (n, td), 0)
    is_first = row == 0
    is_last = row == (n - 1)

    for b in range(tb):                    # small static unroll (tb <= _MAX_TB)
        f = x_ref[b]                       # (N, TD) slab, one full load
        # Circular sublane shifts on the XLU slot (free wrt VPU / ld-st slots).
        f_next = pltpu.roll(f, shift=n - 1, axis=0)   # f_next[i] = f[(i + 1) % n]
        f_prev = pltpu.roll(f, shift=1, axis=0)       # f_prev[i] = f[(i - 1) % n]
        d_next = f_next - f
        d_prev = f_prev - f
        # Interior: (f_next - f) + (f_prev - f)  -- avoids the 2*f multiply.
        # Boundary rows replace the wrap-around garbage from the circular shift.
        lap = jnp.where(is_first, d_next,
                        jnp.where(is_last, d_prev, d_next + d_prev))
        # alpha folded into one multiply; single full unmasked store per slab.
        o_ref[b] = (alpha * lap).astype(o_ref.dtype)


def _pick_td(d: int, n: int, itemsize: int) -> int:
    """Largest embed-dim tile whose (N, TD) slab fits the per-buffer budget.

    Prefers TD = D (contiguous HBM rows); otherwise the largest 128-multiple
    divisor of D that fits; falls back to any divisor.
    """
    max_elems = max(1, _SLAB_BUDGET_BYTES // (n * itemsize))
    if d <= max_elems:
        return d
    divisors = [t for t in range(1, d + 1) if d % t == 0 and t <= max_elems]
    lane_dense = [t for t in divisors if t % 128 == 0]
    return max(lane_dense) if lane_dense else max(divisors)


def _pick_tb(b: int, d: int, n: int, td: int, itemsize: int) -> int:
    """Batch tile: fold batch when the (N, TD) slab is small; keep >= 2 grid steps."""
    slab = n * td * itemsize
    max_tb = min(b, _MAX_TB, max(1, _SLAB_BUDGET_BYTES // slab))
    tb = 1
    for cand in range(max_tb, 0, -1):
        if b % cand == 0:
            tb = cand
            break
    # v7x has 2 TensorCores per chip: keep at least 2 grid steps so both stay busy.
    if (b // tb) * (d // td) < 2 and b >= 2:
        for cand in range(tb - 1, 0, -1):
            if b % cand == 0 and (b // cand) >= 2:
                tb = cand
                break
    return tb


def diffusion_operator(fields: jax.Array, diffusion_coeff: jax.Array) -> jax.Array:
    """Pallas implementation of DiffusionOperator.forward.

    fields: [B, N, D]
    diffusion_coeff: scalar parameter (learnable in the torch module)
    """
    B, N, D = fields.shape
    itemsize = jnp.dtype(fields.dtype).itemsize

    # Keep alpha in f32 for SMEM (32-bit scalars); cast only at the store.
    alpha = jnp.clip(diffusion_coeff, 0.01, 1.0).astype(jnp.float32).reshape(1)

    TD = _pick_td(D, N, itemsize)
    TB = _pick_tb(B, D, N, TD, itemsize)
    grid = (B // TB, D // TD)

    cost = pl.CostEstimate(
        flops=4 * B * N * D,
        transcendentals=0,
        bytes_accessed=2 * B * N * D * itemsize,
    )

    return pl.pallas_call(
        _diffusion_kernel,
        out_shape=jax.ShapeDtypeStruct((B, N, D), fields.dtype),
        grid_spec=pltpu.PrefetchScalarGridSpec(
            num_scalar_prefetch=0,
            grid=grid,
            in_specs=[
                pl.BlockSpec(memory_space=pltpu.SMEM),                 # alpha (1,) f32
                pl.BlockSpec((TB, N, TD), lambda b, d: (b, 0, d)),     # fields tile
            ],
            out_specs=pl.BlockSpec((TB, N, TD), lambda b, d: (b, 0, d)),
        ),
        compiler_params=pltpu.CompilerParams(
            dimension_semantics=("parallel", "parallel"),
            vmem_limit_bytes=_VMEM_LIMIT_BYTES,
        ),
        cost_estimate=cost,
    )(alpha, fields)


def _reference(fields, diffusion_coeff):
    """Pure-JAX mirror of the PyTorch forward, for verification."""
    B, N, D = fields.shape
    alpha = jnp.clip(diffusion_coeff, 0.01, 1.0)
    lap = jnp.zeros_like(fields)
    if N > 2:
        lap = lap.at[:, 1:-1, :].set(
            fields[:, 2:, :] - 2 * fields[:, 1:-1, :] + fields[:, :-2, :])
    if N > 1:
        lap = lap.at[:, 0, :].set(fields[:, 1, :] - fields[:, 0, :])
        lap = lap.at[:, -1, :].set(fields[:, -2, :] - fields[:, -1, :])
    return alpha * lap


if __name__ == "__main__":
    # Deterministic parameter init (matches nn.Parameter(torch.tensor(0.1))).
    diffusion_coeff = jnp.float32(0.1)

    # Small shapes implied by the forward: batch=2, num_tokens=8, embed_dim=32.
    key = jax.random.PRNGKey(0)
    fields = jax.random.normal(key, (2, 8, 32), dtype=jnp.float32)

    out = diffusion_operator(fields, diffusion_coeff)
    out = jax.block_until_ready(out)

    ref = _reference(fields, diffusion_coeff)
    assert out.shape == ref.shape and out.dtype == ref.dtype
    assert jnp.allclose(out, ref, atol=1e-5, rtol=1e-5)

    print("KERNEL_OK")
</pallas_src>

<mosaic_0001>
module attributes {stable_mosaic.version = 11 : i64} {
  func.func @_diffusion_kernel(%arg0: i32, %arg1: i32, %arg2: memref<1xf32, #tpu.memory_space<smem>>, %arg3: memref<1x8x32xf32, #tpu.memory_space<vmem>>, %arg4: memref<1x8x32xf32, #tpu.memory_space<vmem>>) attributes {dimension_semantics = [#tpu.dimension_semantics<parallel>, #tpu.dimension_semantics<parallel>], iteration_bounds = array<i64: 2, 1>, scalar_prefetch = 0 : i64, scratch_operands = 0 : i64, tpu.core_type = #tpu.core_type<tc>, window_params = [{transform_indices = @transform_0, window_bounds = array<i64: 1>}, {transform_indices = @transform_1, window_bounds = array<i64: 1, 8, 32>}, {transform_indices = @transform_2, window_bounds = array<i64: 1, 8, 32>}]} {
    %c0 = arith.constant 0 : index
    %0 = memref.load %arg2[%c0] : memref<1xf32, #tpu.memory_space<smem>>
    %1 = tpu.iota {dimensions = array<i32: 0>} : vector<8x32xi32>
    %c0_i32 = arith.constant 0 : i32
    %2 = vector.broadcast %c0_i32 : i32 to vector<8x32xi32>
    %3 = arith.cmpi eq, %1, %2 : vector<8x32xi32>
    %c7_i32 = arith.constant 7 : i32
    %4 = vector.broadcast %c7_i32 : i32 to vector<8x32xi32>
    %5 = arith.cmpi eq, %1, %4 : vector<8x32xi32>
    %c0_0 = arith.constant 0 : index
    %c0_1 = arith.constant 0 : index
    %c0_2 = arith.constant 0 : index
    %6 = vector.load %arg3[%c0_0, %c0_1, %c0_2] : memref<1x8x32xf32, #tpu.memory_space<vmem>>, vector<1x8x32xf32>
    %7 = vector.shape_cast %6 : vector<1x8x32xf32> to vector<8x32xf32>
    %c7_i32_3 = arith.constant 7 : i32
    %8 = tpu.dynamic_rotate %7 by %c7_i32_3 dim 0 : vector<8x32xf32>, i32 -> vector<8x32xf32>
    %c1_i32 = arith.constant 1 : i32
    %9 = tpu.dynamic_rotate %7 by %c1_i32 dim 0 : vector<8x32xf32>, i32 -> vector<8x32xf32>
    %10 = arith.subf %8, %7 : vector<8x32xf32>
    %11 = arith.subf %9, %7 : vector<8x32xf32>
    %12 = arith.addf %10, %11 : vector<8x32xf32>
    %13 = arith.select %5, %11, %12 : vector<8x32xi1>, vector<8x32xf32>
    %14 = arith.select %3, %10, %13 : vector<8x32xi1>, vector<8x32xf32>
    %15 = vector.broadcast %0 : f32 to vector<8x32xf32>
    %16 = arith.mulf %15, %14 : vector<8x32xf32>
    %c0_4 = arith.constant 0 : index
    %c0_5 = arith.constant 0 : index
    %c0_6 = arith.constant 0 : index
    %17 = vector.load %arg4[%c0_4, %c0_5, %c0_6] : memref<1x8x32xf32, #tpu.memory_space<vmem>>, vector<1x8x32xf32>
    %18 = vector.shape_cast %17 : vector<1x8x32xf32> to vector<8x32xf32>
    %19 = vector.shape_cast %16 : vector<8x32xf32> to vector<1x8x32xf32>
    tpu.vector_store %arg4[%c0_4, %c0_5, %c0_6], %19 {strides = array<i32>} : memref<1x8x32xf32, #tpu.memory_space<vmem>>, vector<1x8x32xf32>,
    return
  }
  func.func @transform_0(%arg0: i32, %arg1: i32) -> i32 {
    %c0_i32 = arith.constant 0 : i32
    %c0_i32_0 = arith.constant 0 : i32
    return %c0_i32 : i32
  }
  func.func @transform_1(%arg0: i32, %arg1: i32) -> (i32, i32, i32) {
    %c0_i32 = arith.constant 0 : i32
    %c0_i32_0 = arith.constant 0 : i32
    return %arg0, %c0_i32, %arg1 : i32, i32, i32
  }
  func.func @transform_2(%arg0: i32, %arg1: i32) -> (i32, i32, i32) {
    %c0_i32 = arith.constant 0 : i32
    %c0_i32_0 = arith.constant 0 : i32
    return %arg0, %c0_i32, %arg1 : i32, i32, i32
  }
}

</mosaic_0001>

<bundles_post_ra>
// kernel: tpu_custom_call.1
= control target key start
LH: loop header
LB: loop body
LE: loop exit
PB: predicated region body
PF: predicated region fallthrough
CT: control target
= control target key end

     0   :  { %s670_s0 = inlined_call_operand.<no memory space> [shape: f32[1], index: 0, kind: input, shape index: {}]   ;;  %s671_s1 = inlined_call_operand.hbm [shape: f32[2,8,32], index: 1, kind: input, shape index: {}]   ;;  %s672_s2 = inlined_call_operand.hbm [shape: f32[2,8,32], index: 2, kind: output, shape index: {}]  }
   0x1   :  { %7 = sst [smem:[#allocation2]] %s670_s0 }
   0x2   :  { %8 = vsyncpa [#allocation4], 0 }
   0x3   :  { %10 = vsyncpa [#allocation4 + $0x1], 0 }
   0x4   :  { %11 = vsyncpa [#allocation5], 0 }
   0x5   :  { %13 = vsyncpa [#allocation5 + $0x1], 0  ;;  %s498_s11 = smov 0   ;;  %s500_s12 = smov 0  }
   0x6   :  { %s502_s13 = smov 0   ;;  %s504_s14 = smov 0  }
   0x7   :  { %s506_s15 = smov 0   ;;  %s508_s16 = smov 0  }
   0x8 LB: > { %s289_s0 = sadd.s32 4294967295, %s476_s16   ;;  %s290_s17 = sadd.s32 4294967294, %s476_s16   ;;  %s476_s16 = sphi %s508_s16, %s19_s16   ;;  %s472_s15 = sphi %s506_s15, %s688_s15   ;;  %s468_s14 = sphi %s504_s14, %s687_s14   ;;  %s464_s13 = sphi %s502_s13, %s686_s13   ;;  %s460_s12 = sphi %s500_s12, %s685_s12   ;;  %s456_s11 = sphi %s498_s11, %s684_s11  }
   0x9   : > { %s31_s18 = sadd.s32 1, %s472_s15  ;;  %s61_s19 = sadd.s32 1, %s464_s13 }
   0xa   : > { %p33_p0 = scmp.ge.s32.totalorder %s31_s18, 2  ;;  %p68_p1 = scmp.ne.s32.totalorder %s464_s13, %s460_s12 }
   0xb   : > { %p69_p2 = scmp.eq.s32.totalorder %s476_s16, 0  ;;  %p74_p3 = scmp.ne.s32.totalorder %s460_s12, %s456_s11 }
   0xc   : > { %s690_s18 = smov (%p33_p0, %s31_s18), 0  ;;  %p75_p5 = scmp.eq.s32.totalorder %s289_s0, 0 }
   0xd   : > { %p539_p4 = por %p69_p2, %p68_p1  ;;  %s56_s21 = ssub.s32 %s472_s15, %s690_s18 }
   0xe   : > { %p100_p6 = scmp.eq.s32.totalorder %s289_s0, 1  ;;  %p59_p7 = scmp.eq.s32.totalorder %s56_s21, 0 }
   0xf   : > { %p545_p8 = por %p75_p5, %p74_p3  ;;  %p106_p10 = scmp.eq.s32.totalorder %s290_s17, 1 }
  0x10   : > { %p549_p9 = por %p100_p6, %p68_p1  ;;  %p314_p13 = scmp.lt.s32.totalorder %s476_s16, 2 }
  0x11   : > { %s554_s24 = scalar_select %p59_p7, %s464_s13, %s61_s19  }
  0x12   : > { %s676_s23 = scalar_select %p549_p9, 1, 0 }
  0x13   : > { %p556_p11 = por %p106_p10, %p74_p3  ;;  %s129_s26 = sand.u32 1, %s464_s13  }
  0x14   : > { %s293_s27 = sshll.u32 %s129_s26, 3  ;;  %s294_s28 = sshll.u32 %s472_s15, 7 }
  0x15   : > { %s677_s25 = scalar_select %p556_p11, 1, 0 }
  0x16   : > { %s567_s3 = scalar_lea.hbm %s671_s1, %s294_s28  ;;  %s133_s4 = scalar_lea.vmem [#allocation3], %s293_s27 }
  0x17   : > { %s141_s5 = sshll.u32 %s133_s4, 4  ;;  %p573_p0 = pnand %p314_p13, %p539_p4  ;;  %s569_s5 = int_to_ptr.vmem [resolvable:$true] %s141_s5 }
  0x18   : > { %s130_s7 = scalar_lea.sflag [#allocation4], %s129_s26  ;;  %s364_s8 = scalar_lea.hbm %s567_s3, 128 }
  0x19   : > { %p365_p3 = scmp.ne.s32.totalorder %s567_s3, %s364_s8  ;;  %p366_p5 = pneg %p573_p0 }
  0x1a   : > { %s369_s0 = scalar_lea.hbm %s671_s1, 256  ;;  %p370_p4 = scmp.lt.u32.totalorder %s567_s3, %s671_s1 }
  0x1b   : > { %p367_p6 = pnand %p366_p5, %p365_p3  ;;  %p371_p10 = scmp.lt.u32.totalorder %s369_s0, %s364_s8 }
  0x1c   : > { %p373_p12 = scmp.lt.u32.totalorder %s364_s8, %s567_s3 }
  0x1d   : > { %p368_p7 = pneg %p367_p6  ;;  %p372_p13 = por %p371_p10, %p370_p4 }
  0x1f   : > { %p374_p1 = por %p373_p12, %p372_p13 }
  0x21   : > { %p375_p2 = pnand %p374_p1, %p368_p7 }
  0x23   : > { %378 = shalt.err (!%p375_p2)
}
  0x24   : > { %s379_s20 = scalar_lea.vmem %s569_s5, 128  ;;  %s478_s21 = smov [#allocation3]  }
  0x25   : > { %p380_p3 = scmp.ne.s32.totalorder %s569_s5, %s379_s20  ;;  %s384_s26 = sshll.u32 %s478_s21, 4  ;;  %s385_s26 = int_to_ptr.vmem [resolvable:$false] %s384_s26 }
  0x26   : > { %s386_s27 = scalar_lea.vmem %s385_s26, 256  ;;  %p387_p9 = scmp.lt.s32.totalorder %s569_s5, %s385_s26 }
  0x27   : > { %p382_p6 = pnand %p380_p3, %p366_p5  ;;  %p388_p4 = scmp.lt.s32.totalorder %s386_s27, %s379_s20 }
  0x29   : > { %p383_p11 = pneg %p382_p6  ;;  %p389_p10 = por %p388_p4, %p387_p9 }
  0x2b   : > { %p390_p12 = pnand %p389_p10, %p383_p11 }
  0x2d   : > { %393 = shalt.err (!%p390_p12)
}
  0x2e   : > { %309 = dma.hbm_to_vmem [thread:$0]  (!%p573_p0), %s567_s3, 128, %s569_s5, %s130_s7  }
  0x2f   : > { %p679_p1 = scmp.lt.s32.totalorder %s476_s16, 3  ;;  %p680_p2 = scmp.ge.s32.totalorder %s476_s16, 1 }
  0x31   : > { %p147_p5 = pnand %p680_p2, %p679_p1 }
  0x32   : > { %s609_s28 = sand.u32 (!%p147_p5), 1, %s460_s12  }
  0x33   : > { %150 = sbr.rel (%p147_p5) target bundleno = 85 (0x55), region = 28  ;;  %s296_s29 = sshll.u32 (!%p147_p5), %s609_s28, 3 }
  0x34   : > { %s153_s30 = scalar_lea.sflag (!%p147_p5), [#allocation4], %s609_s28  ;;  %s156_s4 = scalar_lea.vmem (!%p147_p5), [#allocation3], %s296_s29 }
  0x3a   : > { %447 = dma.done.wait (%p545_p8), %s153_s30, 128  }
  0x3b   : > { %449 = vsyncadd (%p545_p8), %s153_s30, 4294967168  ;;  %v178_v0 = vlaneseq  ;;  %s177_s3 = sld [smem:[#allocation2]]  ;;  %v182_v2 = vld [vmem:[%s156_s4] sm:$0xff]  ;;  %s176_s5 = scalar_lea.vmem [#allocation6], %s296_s29  ;;  %vm192_vm2 = vcmask 261120  }
  0x3c   : > { %v183_v3 = vrot.slane %v182_v2, 1  ;;  %v184_v4 = vrot.slane %v182_v2, 7  ;;  %s209_s6 = sshll.u32 %s176_s5, 4  ;;  %s299_s7 = sshll.u32 %s468_s14, 7  ;;  %s618_s6 = int_to_ptr.vmem [resolvable:$true] %s209_s6 }
  0x3d   : > { %v179_v1 = vshrl.u32 %v178_v0, 7  ;;  %s623_s9 = scalar_lea.hbm %s672_s2, %s299_s7  ;;  %s195_s10 = scalar_lea.sflag [#allocation5], %s609_s28 }
  0x3e   : > { %v185_v5 = vsub.f32 %v183_v3, %v182_v2  ;;  %v186_v6 = vsub.f32 %v184_v4, %v182_v2  ;;  %s394_s0 = scalar_lea.vmem %s618_s6, 128  ;;  %p681_p9 = scmp.ne.s32.totalorder %s676_s23, 0 }
  0x3f   : > { %vm181_vm0 = vcmp.eq.s32.totalorder %v179_v1, 7  ;;  %vm180_vm1 = vcmp.eq.s32.totalorder %v179_v1, 0  ;;  %p395_p8 = scmp.ne.s32.totalorder %s618_s6, %s394_s0  ;;  %s479_s14 = smov [#allocation6]  }
  0x40   : > { %v187_v7 = vadd.f32 %v186_v6, %v185_v5  ;;  %s398_s17 = sshll.u32 %s479_s14, 4  ;;  %s399_s17 = int_to_ptr.vmem [resolvable:$false] %s398_s17 }
  0x41   : > { %v190_v8 = vstv %s177_s3  ;;  %p396_p11 = pnand %p395_p8, %p681_p9  ;;  %s400_s19 = scalar_lea.vmem %s399_s17, 256 }
  0x42   : > { %v188_v9 = vsel %vm181_vm0, %v186_v6, %v187_v7  ;;  %p401_p7 = scmp.lt.s32.totalorder %s618_s6, %s399_s17  ;;  %p402_p13 = scmp.lt.s32.totalorder %s400_s19, %s394_s0 }
  0x43   : > { %v189_v10 = vsel %vm180_vm1, %v185_v5, %v188_v9  ;;  %p397_p0 = pneg %p396_p11 }
  0x44   : > { %v191_v11 = vmul.f32 %v190_v8, %v189_v10  ;;  %p403_p3 = por %p402_p13, %p401_p7 }
  0x46   : > { %193 = vst.msk [vmem:[%s176_s5] sm:$0xff] %vm192_vm2, %v191_v11  ;;  %p404_p6 = pnand %p403_p3, %p397_p0 }
  0x48   : > { %407 = shalt.err (!%p404_p6)
}
  0x49   : > { %s408_s20 = scalar_lea.hbm %s623_s9, 128  ;;  %s412_s27 = scalar_lea.hbm %s672_s2, 256 }
  0x4a   : > { %p409_p4 = scmp.ne.s32.totalorder %s623_s9, %s408_s20  ;;  %p413_p1 = scmp.lt.u32.totalorder %s623_s9, %s672_s2 }
  0x4b   : > { %p414_p2 = scmp.lt.u32.totalorder %s412_s27, %s408_s20  ;;  %p416_p8 = scmp.lt.u32.totalorder %s408_s20, %s623_s9 }
  0x4c   : > { %p410_p10 = pnand %p409_p4, %p681_p9 }
  0x4d   : > { %p415_p5 = por %p414_p2, %p413_p1 }
  0x4e   : > { %p411_p12 = pneg %p410_p10 }
  0x4f   : > { %p417_p11 = por %p416_p8, %p415_p5 }
  0x51   : > { %p418_p0 = pnand %p417_p11, %p411_p12 }
  0x53   : > { %421 = shalt.err (!%p418_p0)
}
  0x54   : > { %304 = dma.vmem_to_hbm [thread:$0]  (%p681_p9), %s618_s6, 128, %s623_s9, %s195_s10  }
  0x55 PF: > { %s221_s30 = sand.u32 1, %s456_s11   ;;  %p682_p7 = scmp.ne.s32.totalorder %s677_s25, 0 }
  0x56   : > { %p683_p13 = scmp.ge.s32.totalorder %s476_s16, 2  ;;  %s222_s4 = scalar_lea.sflag [#allocation5], %s221_s30 }
  0x58   : > { %p311_p3 = pnand %p683_p13, %p682_p7 }
  0x5a   : > { %451 = dma.done.wait (!%p311_p3), %s222_s4, 128  }
  0x5b   : > { %453 = vsyncadd (!%p311_p3), %s222_s4, 4294967168  ;;  %s19_s16 = sadd.s32 1, %s476_s16   ;;  %s684_s11 = smov %s460_s12 }
  0x5c   : > { %p16_p6 = scmp.ge.s32.totalorder %s19_s16, 4   ;;  %s685_s12 = smov %s464_s13 }
  0x5d   : > { %s686_s13 = smov %s554_s24  ;;  %s687_s14 = smov %s472_s15 }
  0x5e   : > { %s688_s15 = smov %s690_s18  ;;  %18 = sbr.rel (!%p16_p6) target bundleno = 8 (0x8), region = 73 }
  0x65   :  { %227 = vsyncpa [#allocation4], 1 }
  0x66   :  { %229 = vsyncpa [#allocation4 + $0x1], 1 }
  0x67   :  { %230 = vsyncpa [#allocation5], 1 }
  0x68   :  { %232 = vsyncpa [#allocation5 + $0x1], 1 }

</bundles_post_ra>
